<compile_context>
chip_gen: v7x
topology: tpu7x:2x2x1
jax: 0.10.0
libtpu: 0.0.40
codegen_flags: <defaults>
</compile_context>

<pallas_src>
import functools
import math

import jax
import jax.numpy as jnp
from jax.experimental import pallas as pl
from jax.experimental.pallas import tpu as pltpu

NEG_SLOPE = 0.1
LANE = 128
NEG_BIG = -1e30


def _leaky(x):
    return jnp.where(x >= 0, x, NEG_SLOPE * x)


def _round_up(x, m):
    return ((x + m - 1) // m) * m


def _pad_to(w, rows, cols):
    return jnp.pad(w, ((0, rows - w.shape[0]), (0, cols - w.shape[1])))


# ----------------------------------------------------------------------------- kernel
def tagger_head_kernel(scale,
                       seq_ref, gidx_ref, kbias_ref,
                       wes_ref, bes_ref, wa_ref,
                       wge_ref, wga_ref, bg_ref,
                       wl1_ref, wl2_ref, bl_ref,
                       pred_ref):
    """One batch tile: gather -> MLPs -> attention -> gate -> label logits -> argmax."""
    seq = seq_ref[...].astype(jnp.bfloat16)          # (TB, S, H) encoder output tile
    TB, S, H = seq.shape
    gidx = gidx_ref[0]                               # (TB, L, 1) int32 (== S for padded rows)
    L = gidx.shape[1]
    kbias = kbias_ref[0]                             # (TB, 1, L) f32, 0 valid / -1e30 padded key
    Mp = wa_ref.shape[0]

    # --- valid-token gather as a one-hot matmul on the MXU -------------------------
    # onehot[b, l, s] = (gidx[b, l] == s); padded rows (gidx == S) gather zeros,
    # matching the reference's zero-initialized valid_output.
    s_iota = jax.lax.broadcasted_iota(jnp.int32, (TB, L, S), 2)
    onehot = (gidx == s_iota).astype(jnp.bfloat16)                       # (TB, L, S)
    x = jnp.einsum('bls,bsh->blh', onehot, seq,
                   preferred_element_type=jnp.float32)                    # (TB, L, H)
    x2 = x.reshape(TB * L, H).astype(jnp.bfloat16)                        # fold batch into rows

    # --- fused MLP_e | MLP_s (inference: dropout is identity) ----------------------
    h = jnp.dot(x2, wes_ref[...], preferred_element_type=jnp.float32) + bes_ref[...]
    h = _leaky(h)                                                         # (TB*L, 2*Mp)
    h_e = h[:, :Mp]
    h_s = h[:, Mp:]
    h_s_b = h_s.astype(jnp.bfloat16)

    # --- attention over word positions (block-diagonal per batch element) ----------
    q = jnp.dot(h_s_b, wa_ref[...], preferred_element_type=jnp.float32)   # (TB*L, Mp)
    q3 = q.reshape(TB, L, Mp).astype(jnp.bfloat16)
    k3 = h_s_b.reshape(TB, L, Mp)
    # contract last dims directly (no explicit transpose)
    scores = jnp.einsum('bqm,bkm->bqk', q3, k3,
                        preferred_element_type=jnp.float32) * scale + kbias   # (TB, L, L)
    scores = scores - jnp.max(scores, axis=-1, keepdims=True)
    p = jnp.exp(scores)
    attn = p * pl.reciprocal(jnp.sum(p, axis=-1, keepdims=True), approx=True)
    a3 = jnp.einsum('bqk,bkm->bqm', attn.astype(jnp.bfloat16), k3,
                    preferred_element_type=jnp.float32)                   # (TB, L, Mp)
    a = a3.reshape(TB * L, Mp)

    # --- gate: g = sigmoid(h_e W_ge + a W_ga + b_g)  (split matmuls, no lane concat)
    h_e_b = h_e.astype(jnp.bfloat16)
    a_b = a.astype(jnp.bfloat16)
    g_lin = (jnp.dot(h_e_b, wge_ref[...], preferred_element_type=jnp.float32)
             + jnp.dot(a_b, wga_ref[...], preferred_element_type=jnp.float32)
             + bg_ref[...])
    g = jax.nn.sigmoid(g_lin)                                             # (TB*L, Mp)

    # --- label decoder: (g*h_e) Wl1 + ((1-g)*a) Wl2 + b_l, then fused argmax --------
    o1 = (g * h_e).astype(jnp.bfloat16)
    o2 = ((1.0 - g) * a).astype(jnp.bfloat16)
    logits = (jnp.dot(o1, wl1_ref[...], preferred_element_type=jnp.float32)
              + jnp.dot(o2, wl2_ref[...], preferred_element_type=jnp.float32)
              + bl_ref[...])                                              # (TB*L, Cp)
    Cp = logits.shape[-1]
    logits3 = logits.reshape(TB, L, Cp)
    mx = jnp.max(logits3, axis=-1, keepdims=True)
    c_iota = jax.lax.broadcasted_iota(jnp.int32, (TB, L, Cp), 2)
    pred = jnp.min(jnp.where(logits3 == mx, c_iota, Cp), axis=-1, keepdims=True)
    pred_ref[0] = pred.astype(jnp.int32)                                  # (TB, L, 1)


# ----------------------------------------------------------------------------- wrapper
def compute_gather_indices(valid_ids, attention_mask_label):
    """gidx[i, j] = subword position of the j-th valid token of batch i (S if padded)."""
    B, S = valid_ids.shape
    L = attention_mask_label.shape[1]
    key = jnp.where(valid_ids == 1, 0, 1).astype(jnp.int32)
    order = jnp.argsort(key, axis=1, stable=True)[:, :L]   # valid positions first, original order
    sent_len = attention_mask_label.astype(jnp.int32).sum(axis=1)
    keep = jnp.arange(L)[None, :] < sent_len[:, None]
    return jnp.where(keep, order, S).astype(jnp.int32)     # (B, L)


def prepare_params(params, n_mlp, num_out):
    """Fuse / lane-pad / bf16-cast the head weights (do once, offline).

    NOTE: wg1/wg2 and wl1/wl2 must correspond to the [h_e ; a] / [o1 ; o2] row
    ordering of the original W_g / W_label when loading a pretrained checkpoint.
    """
    Mp = _round_up(n_mlp, LANE)
    Cp = _round_up(num_out, LANE)
    we = _pad_to(params["we"], params["we"].shape[0], Mp)
    ws = _pad_to(params["ws"], params["ws"].shape[0], Mp)
    be = _pad_to(params["be"], 1, Mp)
    bs = _pad_to(params["bs"], 1, Mp)
    wa = _pad_to(params["wa"], Mp, Mp)
    wg_e = _pad_to(params["wg1"], Mp, Mp)
    wg_a = _pad_to(params["wg2"], Mp, Mp)
    bg = _pad_to(params["bg"], 1, Mp)
    wl1 = _pad_to(params["wl1"], Mp, Cp)
    wl2 = _pad_to(params["wl2"], Mp, Cp)
    bl = jnp.pad(params["bl"], ((0, 0), (0, Cp - params["bl"].shape[1])),
                 constant_values=NEG_BIG)   # padded classes never win the argmax
    return {
        "wes": jnp.concatenate([we, ws], axis=1).astype(jnp.bfloat16),   # (H, 2*Mp)
        "bes": jnp.concatenate([be, bs], axis=1).astype(jnp.float32),    # (1, 2*Mp)
        "wa":  wa.astype(jnp.bfloat16),                                  # (Mp, Mp)
        "wg_e": wg_e.astype(jnp.bfloat16),                               # (Mp, Mp)
        "wg_a": wg_a.astype(jnp.bfloat16),                               # (Mp, Mp)
        "bg":  bg.astype(jnp.float32),                                   # (1, Mp)
        "wl1": wl1.astype(jnp.bfloat16),                                 # (Mp, Cp)
        "wl2": wl2.astype(jnp.bfloat16),                                 # (Mp, Cp)
        "bl":  bl.astype(jnp.float32),                                   # (1, Cp)
        "n_mlp": n_mlp,
    }


def tagger_forward(sequence_output, valid_ids, attention_mask_label, prepared, *, tile_b=8):
    """Inference path of Tagger.forward (labels/tag_labels None) -> pre_labels (B, L) int32.

    Positions >= sent_len are argmax over padded-row activations (same as the PyTorch
    reference); downstream code is expected to mask them with attention_mask_label.
    """
    B, S, H = sequence_output.shape
    L = attention_mask_label.shape[1]
    Mp = prepared["wa"].shape[0]
    Cp = prepared["wl1"].shape[1]
    scale = 1.0 / math.sqrt(prepared["n_mlp"])

    gidx = compute_gather_indices(valid_ids, attention_mask_label)   # (B, L)

    TB = max(1, min(tile_b, B))
    nb = (B + TB - 1) // TB
    Bp = nb * TB
    if Bp != B:
        sequence_output = jnp.pad(sequence_output, ((0, Bp - B), (0, 0), (0, 0)))
        gidx = jnp.pad(gidx, ((0, Bp - B), (0, 0)), constant_values=S)
        attention_mask_label = jnp.pad(attention_mask_label, ((0, Bp - B), (0, 0)))

    # tiny per-position side inputs, laid out so the kernel needs no relayouts
    gidx4 = gidx.reshape(nb, TB, L, 1)
    kbias4 = jnp.where(attention_mask_label, 0.0, NEG_BIG).astype(jnp.float32).reshape(nb, TB, 1, L)

    kernel = functools.partial(tagger_head_kernel, scale)
    const2d = lambda b: (0, 0)

    pred = pl.pallas_call(
        kernel,
        out_shape=jax.ShapeDtypeStruct((nb, TB, L, 1), jnp.int32),
        grid_spec=pltpu.PrefetchScalarGridSpec(
            num_scalar_prefetch=0,
            grid=(nb,),
            in_specs=[
                pl.BlockSpec((TB, S, H), lambda b: (b, 0, 0)),          # encoder output tile
                pl.BlockSpec((1, TB, L, 1), lambda b: (b, 0, 0, 0)),    # gather indices
                pl.BlockSpec((1, TB, 1, L), lambda b: (b, 0, 0, 0)),    # attention key-mask bias
                pl.BlockSpec((H, 2 * Mp), const2d),                     # [W_e | W_s]
                pl.BlockSpec((1, 2 * Mp), const2d),                     # [b_e | b_s]
                pl.BlockSpec((Mp, Mp), const2d),                        # W_attn
                pl.BlockSpec((Mp, Mp), const2d),                        # W_gate (h_e rows)
                pl.BlockSpec((Mp, Mp), const2d),                        # W_gate (a rows)
                pl.BlockSpec((1, Mp), const2d),                         # b_gate
                pl.BlockSpec((Mp, Cp), const2d),                        # W_label (o1 rows)
                pl.BlockSpec((Mp, Cp), const2d),                        # W_label (o2 rows)
                pl.BlockSpec((1, Cp), const2d),                         # b_label
            ],
            out_specs=pl.BlockSpec((1, TB, L, 1), lambda b: (b, 0, 0, 0)),
        ),
        compiler_params=pltpu.CompilerParams(
            dimension_semantics=("parallel",),          # batch-tile axis splits across TCs on v7x
            vmem_limit_bytes=32 * 1024 * 1024,
        ),
    )(sequence_output, gidx4, kbias4,
      prepared["wes"], prepared["bes"], prepared["wa"],
      prepared["wg_e"], prepared["wg_a"], prepared["bg"],
      prepared["wl1"], prepared["wl2"], prepared["bl"])

    return pred.reshape(Bp, L)[:B]


# ----------------------------------------------------------------------------- params
def init_params(key, hidden_size, n_mlp, num_label_out):
    ks = jax.random.split(key, 12)

    def lin(k, fan_in, shape):
        bound = 1.0 / math.sqrt(fan_in)
        return jax.random.uniform(k, shape, jnp.float32, -bound, bound)

    return {
        "we":  lin(ks[0], hidden_size, (hidden_size, n_mlp)),
        "be":  lin(ks[1], hidden_size, (1, n_mlp)),
        "ws":  lin(ks[2], hidden_size, (hidden_size, n_mlp)),
        "bs":  lin(ks[3], hidden_size, (1, n_mlp)),
        "wa":  lin(ks[4], n_mlp, (n_mlp, n_mlp)),
        "wg1": lin(ks[5], 2 * n_mlp, (n_mlp, n_mlp)),
        "wg2": lin(ks[6], 2 * n_mlp, (n_mlp, n_mlp)),
        "bg":  lin(ks[7], 2 * n_mlp, (1, n_mlp)),
        "wl1": lin(ks[8], 2 * n_mlp, (n_mlp, num_label_out)),
        "wl2": lin(ks[9], 2 * n_mlp, (n_mlp, num_label_out)),
        "bl":  lin(ks[10], 2 * n_mlp, (1, num_label_out)),
    }


if __name__ == "__main__":
    # small synthetic config: batch, subword len, word len, hidden, n_mlp
    B, S, L, H, M = 4, 16, 8, 32, 32
    n_labels = 6                 # len(labelmap)
    C = n_labels + 2             # label_decoder output dim

    key = jax.random.PRNGKey(0)
    k_seq, k_par = jax.random.split(key)

    # TODO(synk): BERT/XLNet encoder not reimplemented; `sequence_output` stands in for it.
    sequence_output = jax.random.normal(k_seq, (B, S, H), jnp.float32)

    # valid_ids: [CLS]=0, word-start pattern, [SEP]=0, trailing pad=1 (as in convert_examples_to_features)
    valid_ids = jnp.zeros((B, S), jnp.int32)
    valid_ids = valid_ids.at[0, 1:7].set(1)      # 6 valid word starts
    valid_ids = valid_ids.at[1, 1:9:2].set(1)    # 4 valid word starts
    valid_ids = valid_ids.at[2, 1:6].set(1)      # 5 valid word starts
    valid_ids = valid_ids.at[3, 2:12:3].set(1)   # 4 valid word starts
    sent_lens = jnp.array([6, 4, 5, 4], jnp.int32)
    attention_mask_label = (jnp.arange(L)[None, :] < sent_lens[:, None])

    params = init_params(k_par, H, M, C)
    prepared = prepare_params(params, n_mlp=M, num_out=C)

    pre_labels = tagger_forward(sequence_output, valid_ids, attention_mask_label,
                                prepared, tile_b=2)
    jax.block_until_ready(pre_labels)
    assert pre_labels.shape == (B, L)
    assert pre_labels.dtype == jnp.int32
    assert int(pre_labels.max()) < C            # padded classes never selected
    print("KERNEL_OK")
</pallas_src>

<mosaic_0001>
module attributes {stable_mosaic.version = 11 : i64} {
  func.func @tagger_head_kernel(%arg0: i32, %arg1: memref<2x16x32xf32, #tpu.memory_space<vmem>>, %arg2: memref<1x2x8x1xi32, #tpu.memory_space<vmem>>, %arg3: memref<1x2x1x8xf32, #tpu.memory_space<vmem>>, %arg4: memref<32x256xbf16, #tpu.memory_space<vmem>>, %arg5: memref<1x256xf32, #tpu.memory_space<vmem>>, %arg6: memref<128x128xbf16, #tpu.memory_space<vmem>>, %arg7: memref<128x128xbf16, #tpu.memory_space<vmem>>, %arg8: memref<128x128xbf16, #tpu.memory_space<vmem>>, %arg9: memref<1x128xf32, #tpu.memory_space<vmem>>, %arg10: memref<128x128xbf16, #tpu.memory_space<vmem>>, %arg11: memref<128x128xbf16, #tpu.memory_space<vmem>>, %arg12: memref<1x128xf32, #tpu.memory_space<vmem>>, %arg13: memref<1x2x8x1xi32, #tpu.memory_space<vmem>>) attributes {dimension_semantics = [#tpu.dimension_semantics<parallel>], iteration_bounds = array<i64: 2>, scalar_prefetch = 0 : i64, scratch_operands = 0 : i64, tpu.core_type = #tpu.core_type<tc>, window_params = [{transform_indices = @transform_0, window_bounds = array<i64: 2, 16, 32>}, {transform_indices = @transform_1, window_bounds = array<i64: 1, 2, 8, 1>}, {transform_indices = @transform_2, window_bounds = array<i64: 1, 2, 1, 8>}, {pipeline_mode = #tpu.pipeline_mode<synchronous>, transform_indices = @transform_3, window_bounds = array<i64: 32, 256>}, {pipeline_mode = #tpu.pipeline_mode<synchronous>, transform_indices = @transform_4, window_bounds = array<i64: 1, 256>}, {pipeline_mode = #tpu.pipeline_mode<synchronous>, transform_indices = @transform_5, window_bounds = array<i64: 128, 128>}, {pipeline_mode = #tpu.pipeline_mode<synchronous>, transform_indices = @transform_6, window_bounds = array<i64: 128, 128>}, {pipeline_mode = #tpu.pipeline_mode<synchronous>, transform_indices = @transform_7, window_bounds = array<i64: 128, 128>}, {pipeline_mode = #tpu.pipeline_mode<synchronous>, transform_indices = @transform_8, window_bounds = array<i64: 1, 128>}, {pipeline_mode = #tpu.pipeline_mode<synchronous>, transform_indices = @transform_9, window_bounds = array<i64: 128, 128>}, {pipeline_mode = #tpu.pipeline_mode<synchronous>, transform_indices = @transform_10, window_bounds = array<i64: 128, 128>}, {pipeline_mode = #tpu.pipeline_mode<synchronous>, transform_indices = @transform_11, window_bounds = array<i64: 1, 128>}, {transform_indices = @transform_12, window_bounds = array<i64: 1, 2, 8, 1>}]} {
    %c0 = arith.constant 0 : index
    %c0_0 = arith.constant 0 : index
    %c0_1 = arith.constant 0 : index
    %0 = vector.load %arg1[%c0, %c0_0, %c0_1] : memref<2x16x32xf32, #tpu.memory_space<vmem>>, vector<2x16x32xf32>
    %1 = arith.truncf %0 : vector<2x16x32xf32> to vector<2x16x32xbf16>
    %c0_2 = arith.constant 0 : index
    %c0_3 = arith.constant 0 : index
    %c0_4 = arith.constant 0 : index
    %c0_5 = arith.constant 0 : index
    %2 = vector.load %arg2[%c0_2, %c0_3, %c0_4, %c0_5] : memref<1x2x8x1xi32, #tpu.memory_space<vmem>>, vector<1x2x8x1xi32>
    %3 = vector.shape_cast %2 : vector<1x2x8x1xi32> to vector<2x8x1xi32>
    %c0_6 = arith.constant 0 : index
    %c0_7 = arith.constant 0 : index
    %c0_8 = arith.constant 0 : index
    %c0_9 = arith.constant 0 : index
    %4 = vector.load %arg3[%c0_6, %c0_7, %c0_8, %c0_9] : memref<1x2x1x8xf32, #tpu.memory_space<vmem>>, vector<1x2x1x8xf32>
    %5 = vector.shape_cast %4 : vector<1x2x1x8xf32> to vector<2x1x8xf32>
    %6 = tpu.iota {dimensions = array<i32: 2>} : vector<2x8x16xi32>
    %7 = vector.broadcast %3 : vector<2x8x1xi32> to vector<2x8x16xi32>
    %8 = arith.cmpi eq, %7, %6 : vector<2x8x16xi32>
    %9 = arith.extui %8 : vector<2x8x16xi1> to vector<2x8x16xi32>
    %10 = arith.sitofp %9 : vector<2x8x16xi32> to vector<2x8x16xf32>
    %11 = arith.truncf %10 : vector<2x8x16xf32> to vector<2x8x16xbf16>
    "tpu.trace_start"() <{level = 10 : i32, message = "bls,bsh->blh"}> : () -> ()
    %cst = arith.constant dense<0.000000e+00> : vector<2x8x32xf32>
    %12 = tpu.matmul %11, %1, %cst {dimension_numbers = #tpu.dot_dimension_numbers<[2], [1], [1], [2], [0, 0, 0, 1, 1, 2], [0], [0]>} : vector<2x8x16xbf16>, vector<2x16x32xbf16>, vector<2x8x32xf32> -> vector<2x8x32xf32>
    "tpu.trace_stop"() : () -> ()
    %13 = vector.shape_cast %12 : vector<2x8x32xf32> to vector<16x32xf32>
    %14 = arith.truncf %13 : vector<16x32xf32> to vector<16x32xbf16>
    %c0_10 = arith.constant 0 : index
    %c0_11 = arith.constant 0 : index
    %15 = vector.load %arg4[%c0_10, %c0_11] : memref<32x256xbf16, #tpu.memory_space<vmem>>, vector<32x256xbf16>
    %cst_12 = arith.constant dense<0.000000e+00> : vector<16x256xf32>
    %16 = tpu.matmul %14, %15, %cst_12 {dimension_numbers = #tpu.dot_dimension_numbers<[1], [0], [0], [1], [0, 0, 1, 1], [], []>} : vector<16x32xbf16>, vector<32x256xbf16>, vector<16x256xf32> -> vector<16x256xf32>
    %c0_13 = arith.constant 0 : index
    %c0_14 = arith.constant 0 : index
    %17 = vector.load %arg5[%c0_13, %c0_14] : memref<1x256xf32, #tpu.memory_space<vmem>>, vector<1x256xf32>
    %18 = vector.broadcast %17 : vector<1x256xf32> to vector<16x256xf32>
    %19 = arith.addf %16, %18 : vector<16x256xf32>
    %cst_15 = arith.constant 0.000000e+00 : f32
    %20 = vector.broadcast %cst_15 : f32 to vector<16x256xf32>
    %21 = arith.cmpf oge, %19, %20 : vector<16x256xf32>
    %cst_16 = arith.constant 1.000000e-01 : f32
    %22 = vector.broadcast %cst_16 : f32 to vector<16x256xf32>
    %23 = arith.mulf %22, %19 : vector<16x256xf32>
    %24 = arith.select %21, %19, %23 : vector<16x256xi1>, vector<16x256xf32>
    %25 = vector.extract_strided_slice %24 {offsets = [0, 0], sizes = [16, 128], strides = [1, 1]} : vector<16x256xf32> to vector<16x128xf32>
    %26 = vector.extract_strided_slice %24 {offsets = [0, 128], sizes = [16, 128], strides = [1, 1]} : vector<16x256xf32> to vector<16x128xf32>
    %27 = arith.truncf %26 : vector<16x128xf32> to vector<16x128xbf16>
    %c0_17 = arith.constant 0 : index
    %c0_18 = arith.constant 0 : index
    %28 = vector.load %arg6[%c0_17, %c0_18] : memref<128x128xbf16, #tpu.memory_space<vmem>>, vector<128x128xbf16>
    %cst_19 = arith.constant dense<0.000000e+00> : vector<16x128xf32>
    %29 = tpu.matmul %27, %28, %cst_19 {dimension_numbers = #tpu.dot_dimension_numbers<[1], [0], [0], [1], [0, 0, 1, 1], [], []>} : vector<16x128xbf16>, vector<128x128xbf16>, vector<16x128xf32> -> vector<16x128xf32>
    %30 = vector.shape_cast %29 : vector<16x128xf32> to vector<2x8x128xf32>
    %31 = arith.truncf %30 : vector<2x8x128xf32> to vector<2x8x128xbf16>
    %32 = vector.shape_cast %27 : vector<16x128xbf16> to vector<2x8x128xbf16>
    "tpu.trace_start"() <{level = 10 : i32, message = "bqm,bkm->bqk"}> : () -> ()
    %cst_20 = arith.constant dense<0.000000e+00> : vector<2x8x8xf32>
    %33 = tpu.matmul %31, %32, %cst_20 {dimension_numbers = #tpu.dot_dimension_numbers<[2], [2], [1], [1], [0, 0, 0, 1, 1, 1], [0], [0]>} : vector<2x8x128xbf16>, vector<2x8x128xbf16>, vector<2x8x8xf32> -> vector<2x8x8xf32>
    "tpu.trace_stop"() : () -> ()
    %cst_21 = arith.constant 0.176776692 : f32
    %34 = vector.broadcast %cst_21 : f32 to vector<2x8x8xf32>
    %35 = arith.mulf %33, %34 : vector<2x8x8xf32>
    %36 = vector.broadcast %5 : vector<2x1x8xf32> to vector<2x8x8xf32>
    %37 = arith.addf %35, %36 : vector<2x8x8xf32>
    %cst_22 = arith.constant dense<0xFF800000> : vector<2x8xf32>
    %38 = vector.multi_reduction <maximumf>, %37, %cst_22 [2] : vector<2x8x8xf32> to vector<2x8xf32>
    %39 = vector.shape_cast %38 : vector<2x8xf32> to vector<2x8x1xf32>
    %40 = vector.broadcast %39 : vector<2x8x1xf32> to vector<2x8x8xf32>
    %41 = arith.subf %37, %40 : vector<2x8x8xf32>
    %42 = math.exp %41 : vector<2x8x8xf32>
    %cst_23 = arith.constant dense<0.000000e+00> : vector<2x8xf32>
    %43 = vector.multi_reduction <add>, %42, %cst_23 [2] : vector<2x8x8xf32> to vector<2x8xf32>
    %44 = vector.shape_cast %43 : vector<2x8xf32> to vector<2x8x1xf32>
    %45 = tpu.reciprocal %44 {approx = true} : vector<2x8x1xf32> -> vector<2x8x1xf32>
    %46 = vector.broadcast %45 : vector<2x8x1xf32> to vector<2x8x8xf32>
    %47 = arith.mulf %42, %46 : vector<2x8x8xf32>
    %48 = arith.truncf %47 : vector<2x8x8xf32> to vector<2x8x8xbf16>
    "tpu.trace_start"() <{level = 10 : i32, message = "bqk,bkm->bqm"}> : () -> ()
    %cst_24 = arith.constant dense<0.000000e+00> : vector<2x8x128xf32>
    %49 = tpu.matmul %48, %32, %cst_24 {dimension_numbers = #tpu.dot_dimension_numbers<[2], [1], [1], [2], [0, 0, 0, 1, 1, 2], [0], [0]>} : vector<2x8x8xbf16>, vector<2x8x128xbf16>, vector<2x8x128xf32> -> vector<2x8x128xf32>
    "tpu.trace_stop"() : () -> ()
    %50 = vector.shape_cast %49 : vector<2x8x128xf32> to vector<16x128xf32>
    %51 = arith.truncf %25 : vector<16x128xf32> to vector<16x128xbf16>
    %52 = arith.truncf %50 : vector<16x128xf32> to vector<16x128xbf16>
    %c0_25 = arith.constant 0 : index
    %c0_26 = arith.constant 0 : index
    %53 = vector.load %arg7[%c0_25, %c0_26] : memref<128x128xbf16, #tpu.memory_space<vmem>>, vector<128x128xbf16>
    %cst_27 = arith.constant dense<0.000000e+00> : vector<16x128xf32>
    %54 = tpu.matmul %51, %53, %cst_27 {dimension_numbers = #tpu.dot_dimension_numbers<[1], [0], [0], [1], [0, 0, 1, 1], [], []>} : vector<16x128xbf16>, vector<128x128xbf16>, vector<16x128xf32> -> vector<16x128xf32>
    %c0_28 = arith.constant 0 : index
    %c0_29 = arith.constant 0 : index
    %55 = vector.load %arg8[%c0_28, %c0_29] : memref<128x128xbf16, #tpu.memory_space<vmem>>, vector<128x128xbf16>
    %cst_30 = arith.constant dense<0.000000e+00> : vector<16x128xf32>
    %56 = tpu.matmul %52, %55, %cst_30 {dimension_numbers = #tpu.dot_dimension_numbers<[1], [0], [0], [1], [0, 0, 1, 1], [], []>} : vector<16x128xbf16>, vector<128x128xbf16>, vector<16x128xf32> -> vector<16x128xf32>
    %57 = arith.addf %54, %56 : vector<16x128xf32>
    %c0_31 = arith.constant 0 : index
    %c0_32 = arith.constant 0 : index
    %58 = vector.load %arg9[%c0_31, %c0_32] : memref<1x128xf32, #tpu.memory_space<vmem>>, vector<1x128xf32>
    %59 = vector.broadcast %58 : vector<1x128xf32> to vector<16x128xf32>
    %60 = arith.addf %57, %59 : vector<16x128xf32>
    %61 = arith.negf %60 : vector<16x128xf32>
    %62 = math.exp %61 : vector<16x128xf32>
    %cst_33 = arith.constant 1.000000e+00 : f32
    %63 = vector.broadcast %cst_33 : f32 to vector<16x128xf32>
    %64 = arith.addf %63, %62 : vector<16x128xf32>
    %65 = arith.divf %63, %64 : vector<16x128xf32>
    %66 = arith.mulf %65, %25 : vector<16x128xf32>
    %67 = arith.truncf %66 : vector<16x128xf32> to vector<16x128xbf16>
    %cst_34 = arith.constant 1.000000e+00 : f32
    %68 = vector.broadcast %cst_34 : f32 to vector<16x128xf32>
    %69 = arith.subf %68, %65 : vector<16x128xf32>
    %70 = arith.mulf %69, %50 : vector<16x128xf32>
    %71 = arith.truncf %70 : vector<16x128xf32> to vector<16x128xbf16>
    %c0_35 = arith.constant 0 : index
    %c0_36 = arith.constant 0 : index
    %72 = vector.load %arg10[%c0_35, %c0_36] : memref<128x128xbf16, #tpu.memory_space<vmem>>, vector<128x128xbf16>
    %cst_37 = arith.constant dense<0.000000e+00> : vector<16x128xf32>
    %73 = tpu.matmul %67, %72, %cst_37 {dimension_numbers = #tpu.dot_dimension_numbers<[1], [0], [0], [1], [0, 0, 1, 1], [], []>} : vector<16x128xbf16>, vector<128x128xbf16>, vector<16x128xf32> -> vector<16x128xf32>
    %c0_38 = arith.constant 0 : index
    %c0_39 = arith.constant 0 : index
    %74 = vector.load %arg11[%c0_38, %c0_39] : memref<128x128xbf16, #tpu.memory_space<vmem>>, vector<128x128xbf16>
    %cst_40 = arith.constant dense<0.000000e+00> : vector<16x128xf32>
    %75 = tpu.matmul %71, %74, %cst_40 {dimension_numbers = #tpu.dot_dimension_numbers<[1], [0], [0], [1], [0, 0, 1, 1], [], []>} : vector<16x128xbf16>, vector<128x128xbf16>, vector<16x128xf32> -> vector<16x128xf32>
    %76 = arith.addf %73, %75 : vector<16x128xf32>
    %c0_41 = arith.constant 0 : index
    %c0_42 = arith.constant 0 : index
    %77 = vector.load %arg12[%c0_41, %c0_42] : memref<1x128xf32, #tpu.memory_space<vmem>>, vector<1x128xf32>
    %78 = vector.broadcast %77 : vector<1x128xf32> to vector<16x128xf32>
    %79 = arith.addf %76, %78 : vector<16x128xf32>
    %80 = vector.shape_cast %79 : vector<16x128xf32> to vector<2x8x128xf32>
    %cst_43 = arith.constant dense<0xFF800000> : vector<2x8xf32>
    %81 = vector.multi_reduction <maximumf>, %80, %cst_43 [2] : vector<2x8x128xf32> to vector<2x8xf32>
    %82 = vector.shape_cast %81 : vector<2x8xf32> to vector<2x8x1xf32>
    %83 = tpu.iota {dimensions = array<i32: 2>} : vector<2x8x128xi32>
    %84 = vector.broadcast %82 : vector<2x8x1xf32> to vector<2x8x128xf32>
    %85 = arith.cmpf oeq, %80, %84 : vector<2x8x128xf32>
    %c128_i32 = arith.constant 128 : i32
    %86 = vector.broadcast %c128_i32 : i32 to vector<2x8x128xi32>
    %87 = arith.select %85, %83, %86 : vector<2x8x128xi1>, vector<2x8x128xi32>
    %cst_44 = arith.constant dense<2147483647> : vector<2x8xi32>
    %88 = vector.multi_reduction <minsi>, %87, %cst_44 [2] : vector<2x8x128xi32> to vector<2x8xi32>
    %89 = vector.shape_cast %88 : vector<2x8xi32> to vector<2x8x1xi32>
    %c0_45 = arith.constant 0 : index
    %c0_46 = arith.constant 0 : index
    %c0_47 = arith.constant 0 : index
    %c0_48 = arith.constant 0 : index
    %90 = vector.load %arg13[%c0_45, %c0_46, %c0_47, %c0_48] : memref<1x2x8x1xi32, #tpu.memory_space<vmem>>, vector<1x2x8x1xi32>
    %91 = vector.shape_cast %90 : vector<1x2x8x1xi32> to vector<2x8x1xi32>
    %92 = vector.shape_cast %89 : vector<2x8x1xi32> to vector<1x2x8x1xi32>
    tpu.vector_store %arg13[%c0_45, %c0_46, %c0_47, %c0_48], %92 {strides = array<i32>} : memref<1x2x8x1xi32, #tpu.memory_space<vmem>>, vector<1x2x8x1xi32>,
    return
  }
  func.func @transform_0(%arg0: i32) -> (i32, i32, i32) {
    %c0_i32 = arith.constant 0 : i32
    %c0_i32_0 = arith.constant 0 : i32
    %c0_i32_1 = arith.constant 0 : i32
    return %arg0, %c0_i32, %c0_i32_0 : i32, i32, i32
  }
  func.func @transform_1(%arg0: i32) -> (i32, i32, i32, i32) {
    %c0_i32 = arith.constant 0 : i32
    %c0_i32_0 = arith.constant 0 : i32
    %c0_i32_1 = arith.constant 0 : i32
    %c0_i32_2 = arith.constant 0 : i32
    return %arg0, %c0_i32, %c0_i32_0, %c0_i32_1 : i32, i32, i32, i32
  }
  func.func @transform_2(%arg0: i32) -> (i32, i32, i32, i32) {
    %c0_i32 = arith.constant 0 : i32
    %c0_i32_0 = arith.constant 0 : i32
    %c0_i32_1 = arith.constant 0 : i32
    %c0_i32_2 = arith.constant 0 : i32
    return %arg0, %c0_i32, %c0_i32_0, %c0_i32_1 : i32, i32, i32, i32
  }
  func.func @transform_3(%arg0: i32) -> (i32, i32) {
    %c0_i32 = arith.constant 0 : i32
    %c0_i32_0 = arith.constant 0 : i32
    %c0_i32_1 = arith.constant 0 : i32
    return %c0_i32, %c0_i32_0 : i32, i32
  }
  func.func @transform_4(%arg0: i32) -> (i32, i32) {
    %c0_i32 = arith.constant 0 : i32
    %c0_i32_0 = arith.constant 0 : i32
    %c0_i32_1 = arith.constant 0 : i32
    return %c0_i32, %c0_i32_0 : i32, i32
  }
  func.func @transform_5(%arg0: i32) -> (i32, i32) {
    %c0_i32 = arith.constant 0 : i32
    %c0_i32_0 = arith.constant 0 : i32
    %c0_i32_1 = arith.constant 0 : i32
    return %c0_i32, %c0_i32_0 : i32, i32
  }
  func.func @transform_6(%arg0: i32) -> (i32, i32) {
    %c0_i32 = arith.constant 0 : i32
    %c0_i32_0 = arith.constant 0 : i32
    %c0_i32_1 = arith.constant 0 : i32
    return %c0_i32, %c0_i32_0 : i32, i32
  }
  func.func @transform_7(%arg0: i32) -> (i32, i32) {
    %c0_i32 = arith.constant 0 : i32
    %c0_i32_0 = arith.constant 0 : i32
    %c0_i32_1 = arith.constant 0 : i32
    return %c0_i32, %c0_i32_0 : i32, i32
  }
  func.func @transform_8(%arg0: i32) -> (i32, i32) {
    %c0_i32 = arith.constant 0 : i32
    %c0_i32_0 = arith.constant 0 : i32
    %c0_i32_1 = arith.constant 0 : i32
    return %c0_i32, %c0_i32_0 : i32, i32
  }
  func.func @transform_9(%arg0: i32) -> (i32, i32) {
    %c0_i32 = arith.constant 0 : i32
    %c0_i32_0 = arith.constant 0 : i32
    %c0_i32_1 = arith.constant 0 : i32
    return %c0_i32, %c0_i32_0 : i32, i32
  }
  func.func @transform_10(%arg0: i32) -> (i32, i32) {
    %c0_i32 = arith.constant 0 : i32
    %c0_i32_0 = arith.constant 0 : i32
    %c0_i32_1 = arith.constant 0 : i32
    return %c0_i32, %c0_i32_0 : i32, i32
  }
  func.func @transform_11(%arg0: i32) -> (i32, i32) {
    %c0_i32 = arith.constant 0 : i32
    %c0_i32_0 = arith.constant 0 : i32
    %c0_i32_1 = arith.constant 0 : i32
    return %c0_i32, %c0_i32_0 : i32, i32
  }
  func.func @transform_12(%arg0: i32) -> (i32, i32, i32, i32) {
    %c0_i32 = arith.constant 0 : i32
    %c0_i32_0 = arith.constant 0 : i32
    %c0_i32_1 = arith.constant 0 : i32
    %c0_i32_2 = arith.constant 0 : i32
    return %arg0, %c0_i32, %c0_i32_0, %c0_i32_1 : i32, i32, i32, i32
  }
}

</mosaic_0001>

<bundles_post_ra>
// kernel: tpu_custom_call.1
= control target key start
LH: loop header
LB: loop body
LE: loop exit
PB: predicated region body
PF: predicated region fallthrough
CT: control target
= control target key end

     0   :  { %s2973_s0 = inlined_call_operand.hbm [shape: f32[4,16,32], index: 0, kind: input, shape index: {}]   ;;  %s2974_s1 = inlined_call_operand.vmem [shape: s32[2,2,8,1], index: 1, kind: input, shape index: {}]   ;;  %s2975_s2 = inlined_call_operand.vmem [shape: f32[2,2,1,8], index: 2, kind: input, shape index: {}]   ;;  %s2976_s3 = inlined_call_operand.hbm [shape: bf16[32,256], index: 3, kind: input, shape index: {}]   ;;  %s2977_s4 = inlined_call_operand.vmem [shape: f32[1,256], index: 4, kind: input, shape index: {}]   ;;  %s2978_s5 = inlined_call_operand.hbm [shape: bf16[128,128], index: 5, kind: input, shape index: {}]   ;;  %s2979_s6 = inlined_call_operand.hbm [shape: bf16[128,128], index: 6, kind: input, shape index: {}]   ;;  %s2980_s7 = inlined_call_operand.hbm [shape: bf16[128,128], index: 7, kind: input, shape index: {}]   ;;  %s2981_s8 = inlined_call_operand.hbm [shape: f32[1,128], index: 8, kind: input, shape index: {}]   ;;  %s2982_s9 = inlined_call_operand.vmem [shape: bf16[128,128], index: 9, kind: input, shape index: {}]   ;;  %s2983_s10 = inlined_call_operand.hbm [shape: bf16[128,128], index: 10, kind: input, shape index: {}]   ;;  %s2984_s11 = inlined_call_operand.vmem [shape: f32[1,128], index: 11, kind: input, shape index: {}]   ;;  %s2985_s12 = inlined_call_operand.vmem [shape: s32[2,2,8,1], index: 12, kind: output, shape index: {}]  }
   0x1   :  { %2993 = sst [smem:[#allocation17_spill]] %s2975_s2 }
   0x2   :  { %2994 = sst [smem:[#allocation18_spill]] %s2982_s9 }
   0x3   :  { %2995 = sst [smem:[#allocation19_spill]] %s2984_s11 }
   0x4   :  { %2996 = sst [smem:[#allocation20_spill]] %s2985_s12 }
   0x5   :  { %17 = vsyncpa [#allocation3], 0 }
   0x6   :  { %19 = vsyncpa [#allocation3 + $0x1], 0 }
   0x7   :  { %20 = vsyncpa [#allocation5], 0 }
   0x8   :  { %21 = vsyncpa [#allocation8], 0 }
   0x9   :  { %22 = vsyncpa [#allocation11], 0  ;;  %s2525_s21 = smov 0   ;;  %s2527_s22 = smov 0  }
   0xa   :  { %s2529_s23 = smov 0   ;;  %s2531_s24 = smov 0  }
   0xb LB: > { %s2446_s25 = smov [#allocation4]   ;;  %s2546_s27 = sadd.s32 4294967295, %s2444_s24   ;;  %s2444_s24 = sphi %s2531_s24, %s3020_s24   ;;  %s2440_s23 = sphi %s2529_s23, %s3019_s23   ;;  %s2436_s22 = sphi %s2527_s22, %s3018_s22   ;;  %s2432_s21 = sphi %s2525_s21, %s3017_s21  }
   0xc   : > { %s338_s26 = sshll.u32 %s2446_s25, 4  ;;  %p1745_p0 = scmp.ge.s32.totalorder %s2444_s24, 1  ;;  %s2551_s26 = int_to_ptr.vmem [resolvable:$true] %s338_s26 }
   0xd   : > { %p2988_p1 = scmp.eq.s32.totalorder %s2546_s27, 0  ;;  %p326_p2 = scmp.lt.s32.totalorder %s2444_s24, 3 }
   0xe   : > { %s2447_s30 = smov [#allocation7]   ;;  %s2448_s14 = smov [#allocation10]  }
   0xf   : > { %p2553_p3 = pnand %p1745_p0, %p326_p2  ;;  %s367_s13 = sshll.u32 %s2447_s30, 4  ;;  %s2565_s13 = int_to_ptr.vmem [resolvable:$true] %s367_s13 }
  0x10   : > { %s2567_s15 = sshll.u32 %s2448_s14, 4  ;;  %s2200_s18 = scalar_lea.hbm %s2976_s3, 512  ;;  %s395_s15 = int_to_ptr.vmem [resolvable:$true] %s2567_s15 }
  0x11   : > { %s2997_s28 = scalar_select %p2553_p3, 1, 0 }
  0x12   : > { %p2056_p4 = pneg %p2553_p3  ;;  %p2201_p6 = scmp.ne.s32.totalorder %s2976_s3, %s2200_s18 }
  0x13   : > { %p2207_p10 = scmp.lt.u32.totalorder %s2200_s18, %s2976_s3 }
  0x14   : > { %p2561_p5 = pnand %p2056_p4, %p2988_p1 }
  0x16   : > { %p2577_p7 = pneg %p2561_p5 }
  0x18   : > { %p2203_p8 = pnand %p2577_p7, %p2201_p6 }
  0x1a   : > { %p2204_p9 = pneg %p2203_p8 }
  0x1c   : > { %p2209_p11 = pnand %p2207_p10, %p2204_p9 }
  0x1e   : > { %2212 = shalt.err (!%p2209_p11)
}
  0x1f   : > { %s2213_s16 = scalar_lea.vmem %s2551_s26, 512  ;;  %p2221_p2 = scmp.lt.s32.totalorder %s2551_s26, %s2551_s26 }
  0x20   : > { %p2214_p12 = scmp.ne.s32.totalorder %s2551_s26, %s2213_s16  ;;  %p2222_p4 = scmp.lt.s32.totalorder %s2213_s16, %s2213_s16 }
  0x22   : > { %p2216_p13 = pnand %p2214_p12, %p2577_p7  ;;  %p2223_p6 = por %p2222_p4, %p2221_p2 }
  0x24   : > { %p2217_p0 = pneg %p2216_p13 }
  0x26   : > { %p2224_p8 = pnand %p2223_p6, %p2217_p0 }
  0x28   : > { %2227 = shalt.err (!%p2224_p8)
}
  0x29   : > { %s2987_s17 = smov 128   ;;  %s2990_s18 = smov 8  }
  0x2a   : > { %2059 = dma.hbm_to_vmem [thread:$0]  (!%p2561_p5), %s2976_s3, 512, %s2551_s26, [#allocation5], %s2987_s17, %s2987_s17, %s2990_s18  }
  0x2b   : > { %s2228_s16 = scalar_lea.hbm %s2979_s6, 1024 }
  0x2c   : > { %p2229_p9 = scmp.ne.s32.totalorder %s2979_s6, %s2228_s16  ;;  %p2235_p12 = scmp.lt.u32.totalorder %s2228_s16, %s2979_s6 }
  0x2e   : > { %p2231_p10 = pnand %p2229_p9, %p2577_p7 }
  0x30   : > { %p2232_p11 = pneg %p2231_p10 }
  0x32   : > { %p2237_p13 = pnand %p2235_p12, %p2232_p11 }
  0x34   : > { %2240 = shalt.err (!%p2237_p13)
}
  0x35   : > { %s2241_s26 = scalar_lea.vmem %s2565_s13, 1024  ;;  %p2249_p6 = scmp.lt.s32.totalorder %s2565_s13, %s2565_s13 }
  0x36   : > { %p2242_p0 = scmp.ne.s32.totalorder %s2565_s13, %s2241_s26  ;;  %p2250_p8 = scmp.lt.s32.totalorder %s2241_s26, %s2241_s26 }
  0x38   : > { %p2244_p2 = pnand %p2242_p0, %p2577_p7  ;;  %p2251_p9 = por %p2250_p8, %p2249_p6 }
  0x3a   : > { %p2245_p4 = pneg %p2244_p2 }
  0x3c   : > { %p2252_p10 = pnand %p2251_p9, %p2245_p4 }
  0x3e   : > { %2255 = shalt.err (!%p2252_p10)
}
  0x3f   : > { %s2991_s11 = smov 64   ;;  %s2452_s2 = smov 4  }
  0x40   : > { %2065 = dma.hbm_to_vmem [thread:$0]  (!%p2561_p5), %s2979_s6, 1024, %s2565_s13, [#allocation8], %s2991_s11, %s2991_s11, %s2452_s2  }
  0x41   : > { %s2256_s30 = scalar_lea.hbm %s2981_s8, 16 }
  0x42   : > { %p2257_p11 = scmp.ne.s32.totalorder %s2981_s8, %s2256_s30  ;;  %p2263_p0 = scmp.lt.u32.totalorder %s2256_s30, %s2981_s8 }
  0x44   : > { %p2259_p12 = pnand %p2257_p11, %p2577_p7 }
  0x46   : > { %p2260_p13 = pneg %p2259_p12 }
  0x48   : > { %p2265_p2 = pnand %p2263_p0, %p2260_p13 }
  0x4a   : > { %2268 = shalt.err (!%p2265_p2)
}
  0x4b   : > { %s2269_s9 = scalar_lea.vmem %s395_s15, 16  ;;  %s2276_s13 = scalar_lea.vmem %s395_s15, 32 }
  0x4c   : > { %p2270_p4 = scmp.ne.s32.totalorder %s395_s15, %s2269_s9  ;;  %p2277_p9 = scmp.lt.s32.totalorder %s395_s15, %s395_s15 }
  0x4d   : > { %p2278_p10 = scmp.lt.s32.totalorder %s2276_s13, %s2269_s9 }
  0x4e   : > { %p2272_p6 = pnand %p2270_p4, %p2577_p7 }
  0x4f   : > { %p2279_p1 = por %p2278_p10, %p2277_p9 }
  0x50   : > { %p2273_p8 = pneg %p2272_p6 }
  0x52   : > { %p2280_p3 = pnand %p2279_p1, %p2273_p8 }
  0x54   : > { %2283 = shalt.err (!%p2280_p3)
}
  0x55   : > { %2071 = dma.hbm_to_vmem [thread:$0]  (!%p2561_p5), %s2981_s8, 16, %s395_s15, [#allocation11]  }
  0x56   : > { %s2453_s17 = smov [#allocation6]   ;;  %s2454_s30 = smov [#allocation9]  }
  0x57   : > { %s354_s20 = sshll.u32 %s2453_s17, 4  ;;  %s380_s14 = sshll.u32 %s2454_s30, 4  ;;  %s355_s20 = int_to_ptr.vmem [resolvable:$true] %s354_s20  ;;  %s381_s14 = int_to_ptr.vmem [resolvable:$true] %s380_s14 }
  0x58   : > { %s2284_s18 = scalar_lea.hbm %s2978_s5, 1024 }
  0x59   : > { %p2285_p1 = scmp.ne.s32.totalorder %s2978_s5, %s2284_s18  ;;  %p2291_p12 = scmp.lt.u32.totalorder %s2284_s18, %s2978_s5 }
  0x5b   : > { %p2287_p3 = pnand %p2285_p1, %p2577_p7 }
  0x5d   : > { %p2288_p11 = pneg %p2287_p3 }
  0x5f   : > { %p2293_p13 = pnand %p2291_p12, %p2288_p11 }
  0x61   : > { %2296 = shalt.err (!%p2293_p13)
}
  0x62   : > { %s2297_s15 = scalar_lea.vmem %s355_s20, 1024  ;;  %p2305_p6 = scmp.lt.s32.totalorder %s355_s20, %s355_s20 }
  0x63   : > { %p2298_p0 = scmp.ne.s32.totalorder %s355_s20, %s2297_s15  ;;  %p2306_p8 = scmp.lt.s32.totalorder %s2297_s15, %s2297_s15 }
  0x65   : > { %p2300_p2 = pnand %p2298_p0, %p2577_p7  ;;  %p2307_p9 = por %p2306_p8, %p2305_p6 }
  0x67   : > { %p2301_p4 = pneg %p2300_p2 }
  0x69   : > { %p2308_p10 = pnand %p2307_p9, %p2301_p4 }
  0x6b   : > { %2311 = shalt.err (!%p2308_p10)
}
  0x6c   : > { %s3000_s19 = smov 64   ;;  %s2312_s16 = scalar_lea.hbm %s2980_s7, 1024 }
  0x6d   : > { %2062 = dma.hbm_to_vmem [thread:$0]  (!%p2561_p5), %s2978_s5, 1024, %s355_s20, [#allocation5], %s3000_s19, %s3000_s19, %s2452_s2  }
  0x6e   : > { %p2313_p1 = scmp.ne.s32.totalorder %s2980_s7, %s2312_s16  ;;  %p2319_p12 = scmp.lt.u32.totalorder %s2312_s16, %s2980_s7 }
  0x70   : > { %p2315_p3 = pnand %p2313_p1, %p2577_p7 }
  0x72   : > { %p2316_p11 = pneg %p2315_p3 }
  0x74   : > { %p2321_p13 = pnand %p2319_p12, %p2316_p11 }
  0x76   : > { %2324 = shalt.err (!%p2321_p13)
}
  0x77   : > { %s2325_s15 = scalar_lea.vmem %s381_s14, 1024  ;;  %p2333_p6 = scmp.lt.s32.totalorder %s381_s14, %s381_s14 }
  0x78   : > { %p2326_p0 = scmp.ne.s32.totalorder %s381_s14, %s2325_s15  ;;  %p2334_p8 = scmp.lt.s32.totalorder %s2325_s15, %s2325_s15 }
  0x7a   : > { %p2328_p2 = pnand %p2326_p0, %p2577_p7  ;;  %p2335_p9 = por %p2334_p8, %p2333_p6 }
  0x7c   : > { %p2329_p4 = pneg %p2328_p2 }
  0x7e   : > { %p2336_p10 = pnand %p2335_p9, %p2329_p4 }
  0x80   : > { %2339 = shalt.err (!%p2336_p10)
}
  0x81   : > { %2068 = dma.hbm_to_vmem [thread:$0]  (!%p2561_p5), %s2980_s7, 1024, %s381_s14, [#allocation8], %s3000_s19, %s3000_s19, %s2452_s2  }
  0x82   : > { %s2455_s18 = smov [#allocation12]   ;;  %s2340_s26 = scalar_lea.hbm %s2983_s10, 1024 }
  0x83   : > { %s407_s17 = sshll.u32 %s2455_s18, 4  ;;  %p2341_p1 = scmp.ne.s32.totalorder %s2983_s10, %s2340_s26  ;;  %s408_s17 = int_to_ptr.vmem [resolvable:$true] %s407_s17 }
  0x84   : > { %p2347_p12 = scmp.lt.u32.totalorder %s2340_s26, %s2983_s10 }
  0x85   : > { %p2343_p3 = pnand %p2341_p1, %p2577_p7 }
  0x87   : > { %p2344_p11 = pneg %p2343_p3 }
  0x89   : > { %p2349_p13 = pnand %p2347_p12, %p2344_p11 }
  0x8b   : > { %2352 = shalt.err (!%p2349_p13)
}
  0x8c   : > { %s2353_s14 = scalar_lea.vmem %s408_s17, 1024  ;;  %p2361_p6 = scmp.lt.s32.totalorder %s408_s17, %s408_s17 }
  0x8d   : > { %p2354_p0 = scmp.ne.s32.totalorder %s408_s17, %s2353_s14  ;;  %p2362_p8 = scmp.lt.s32.totalorder %s2353_s14, %s2353_s14 }
  0x8f   : > { %p2356_p2 = pnand %p2354_p0, %p2577_p7  ;;  %p2363_p9 = por %p2362_p8, %p2361_p6 }
  0x91   : > { %p2357_p4 = pneg %p2356_p2 }
  0x93   : > { %p2364_p10 = pnand %p2363_p9, %p2357_p4 }
  0x95   : > { %2367 = shalt.err (!%p2364_p10)
}
  0x96   : > { %2074 = dma.hbm_to_vmem [thread:$0]  (!%p2561_p5), %s2983_s10, 1024, %s408_s17, [#allocation11], %s3000_s19, %s3000_s19, %s2452_s2  }
  0x97   : > { %s2710_s29 = sadd.s32 1, %s2444_s24   ;;  %s35_s25 = sadd.s32 1, %s2440_s23 }
  0x98   : > { %s32_s18 = ssub.s32 %s2444_s24, %s2710_s29  ;;  %p42_p7 = scmp.ne.s32.totalorder %s2440_s23, %s2436_s22 }
  0x99   : > { %p33_p1 = scmp.eq.s32.totalorder %s32_s18, 0  ;;  %p43_p3 = scmp.eq.s32.totalorder %s2444_s24, 0 }
  0x9a   : > { %p48_p11 = scmp.ne.s32.totalorder %s2436_s22, %s2432_s21  ;;  %p2085_p12 = scmp.lt.s32.totalorder %s2444_s24, 2 }
  0x9b   : > { %s2722_s30 = scalar_select %p33_p1, %s2440_s23, %s35_s25  }
  0x9c   : > { %p44_p13 = por %p43_p3, %p42_p7  ;;  %p3001_p0 = scmp.eq.s32.totalorder %s2546_s27, 0 }
  0x9d   : > { %s424_s26 = sand.u32 1, %s2440_s23   ;;  %s1832_s2 = sshll.u32 %s2444_s24, 9 }
  0x9e   : > { %p2726_p2 = por %p3001_p0, %p48_p11  ;;  %s1753_s19 = sshll.u32 %s424_s26, 5 }
  0x9f   : > { %s2735_s13 = scalar_lea.hbm %s2973_s0, %s1832_s2  ;;  %s428_s21 = scalar_lea.vmem [#allocation2], %s1753_s19 }
  0xa0   : > { %s436_s12 = sshll.u32 %s428_s21, 4  ;;  %p2737_p5 = pnand %p2085_p12, %p44_p13  ;;  %s2741_s12 = int_to_ptr.vmem [resolvable:$true] %s436_s12 }
  0xa1   : > { %s2743_s24 = scalar_lea.sflag [#allocation3], %s424_s26  ;;  %s2368_s14 = scalar_lea.hbm %s2735_s13, 512 }
  0xa2   : > { %p2369_p4 = scmp.ne.s32.totalorder %s2735_s13, %s2368_s14  ;;  %p2370_p6 = pneg %p2737_p5 }
  0xa3   : > { %s2373_s25 = scalar_lea.hbm %s2973_s0, 1024  ;;  %p2374_p10 = scmp.lt.u32.totalorder %s2735_s13, %s2973_s0 }
  0xa4   : > { %p2371_p8 = pnand %p2370_p6, %p2369_p4  ;;  %p2375_p7 = scmp.lt.u32.totalorder %s2373_s25, %s2368_s14 }
  0xa5   : > { %p2377_p3 = scmp.lt.u32.totalorder %s2368_s14, %s2735_s13 }
  0xa6   : > { %p2372_p9 = pneg %p2371_p8  ;;  %p2376_p1 = por %p2375_p7, %p2374_p10 }
  0xa8   : > { %p2378_p11 = por %p2377_p3, %p2376_p1 }
  0xaa   : > { %p2379_p12 = pnand %p2378_p11, %p2372_p9 }
  0xac   : > { %2382 = shalt.err (!%p2379_p12)
}
  0xad   : > { %s2383_s26 = scalar_lea.vmem %s2741_s12, 512  ;;  %s2456_s19 = smov [#allocation2]  }
  0xae   : > { %p2384_p13 = scmp.ne.s32.totalorder %s2741_s12, %s2383_s26  ;;  %s2388_s17 = sshll.u32 %s2456_s19, 4  ;;  %s2389_s17 = int_to_ptr.vmem [resolvable:$false] %s2388_s17 }
  0xaf   : > { %s2390_s9 = scalar_lea.vmem %s2389_s17, 1024  ;;  %p2391_p8 = scmp.lt.s32.totalorder %s2741_s12, %s2389_s17 }
  0xb0   : > { %p2386_p0 = pnand %p2384_p13, %p2370_p6  ;;  %p2392_p10 = scmp.lt.s32.totalorder %s2390_s9, %s2383_s26 }
  0xb2   : > { %p2387_p4 = pneg %p2386_p0  ;;  %p2393_p7 = por %p2392_p10, %p2391_p8 }
  0xb4   : > { %p2394_p1 = pnand %p2393_p7, %p2387_p4 }
  0xb6   : > { %2397 = shalt.err (!%p2394_p1)
}
  0xb7   : > { %s3004_s21 = smov 8   ;;  %s3005_s14 = smov 128  }
  0xb8   : > { %2078 = dma.hbm_to_vmem [thread:$0]  (!%p2737_p5), %s2735_s13, 512, %s2741_s12, %s2743_s24, %s3005_s14, %s3005_s14, %s3004_s21  }
  0xb9   : > { %p3006_p6 = scmp.ne.s32.totalorder %s2997_s28, 0 }
  0xba   : > { %s465_s20 = sand.u32 (!%p3006_p6), 1, %s2436_s22  }
  0xbb   : > { %463 = sbr.rel (%p3006_p6) target bundleno = 2660 (0xa64), region = 68  ;;  %s1758_s11 = sshll.u32 (!%p3006_p6), %s465_s20, 5 }
  0xbc   : > { %s466_s25 = scalar_lea.sflag (!%p3006_p6), [#allocation3], %s465_s20  ;;  %s469_s18 = scalar_lea.vmem (!%p3006_p6), [#allocation2], %s1758_s11 }
  0xc2   : > { %2415 = dma.done.wait (%p2726_p2), %s466_s25, 512  }
  0xc3   : > { %2417 = vsyncadd (%p2726_p2), %s466_s25, 4294966784  ;;  %p3007_p9 = scmp.eq.s32.totalorder %s2546_s27, 0 }
  0xc5   : > { %2419 = dma.done.wait (%p3007_p9), [#allocation5], 1536   ;;  %p3008_p3 = pmov %p3007_p9 }
  0xc7   : > { %2421 = vsyncadd (%p3008_p3), [#allocation5], 4294965760  ;;  %p3009_p5 = pmov %p3008_p3 }
  0xc8   : > { %p3010_p11 = pmov %p3008_p3 }
  0xc9   : > { %2423 = dma.done.wait (%p3009_p5), [#allocation8], 2048  }
  0xca   : > { %2425 = vsyncadd (%p3010_p11), [#allocation8], 4294965248  ;;  %p3011_p12 = pmov %p3008_p3 }
  0xcb   : > { %p3012_p13 = pmov %p3008_p3 }
  0xcc   : > { %2427 = dma.done.wait (%p3011_p12), [#allocation11], 1040  }
  0xcd   : > { %2429 = vsyncadd (%p3012_p13), [#allocation11], 4294966256  ;;  %p544_p2 = scmp.lt.s32.totalorder %s2546_s27, 1  ;;  %v2457_v0 = vmov 0   ;;  %v2458_v1 = vmov 0.0   ;;  %v559_v4 = vld [vmem:[%s469_s18] sm:$0xff]  ;;  %v569_v11 = vlaneseq }
  0xce   : > { %2137 = vset.pattern.permute.xlu0 %v2457_v0  ;;  %1894 = vmatprep.subr.bf16.mxu0 %v2458_v1  ;;  %v560_v5 = vld [vmem:[%s469_s18 + $0x8] sm:$0xff]  ;;  %v561_v7 = vld [vmem:[%s469_s18 + $0x10] sm:$0xff]  ;;  %v562_v8 = vld [vmem:[%s469_s18 + $0x18] sm:$0xff]  ;;  %vm2459_vm0 = vmmov 0   ;;  %vm585_vm2 = vcmask 130048   ;;  %vm709_vm4 = vcmask 261120  }
  0xcf   : > { %s3022_s27 = smov (!%p544_p2, %s2546_s27), 1  ;;  %1900 = vmatprep.subr.bf16.mxu1 %v2458_v1  ;;  %v563_v6 = vpack.c.bf16 %v560_v5, %v559_v4  ;;  %1896 = vmatprep.mubr.msk.bf16.mxu0 %vm2459_vm0, %v2458_v1  ;;  %v564_v9 = vpack.c.bf16 %v562_v8, %v561_v7  ;;  %v2140_v10 = vld [vmem:[#allocation4 + $0x4] ss:$8 sps:$4 sm:$0xff]   ;;  %v2810_v12 = vand.u32 127, %v569_v11  ;;  %v2138_v15 = vld [vmem:[#allocation4] ss:$8 sps:$4 sm:$0xff]  }
  0xd0   : > { %s1833_s28 = sshll.u32 %s3022_s27, 4  ;;  %1902 = vmatprep.mubr.msk.bf16.mxu1 %vm2459_vm0, %v2458_v1  ;;  %v2143_v20 = vld [vmem:[#allocation4 + $0x14] ss:$8 sps:$4 sm:$0xff]   ;;  %v2141_v21 = vld [vmem:[#allocation4 + $0x10] ss:$8 sps:$4 sm:$0xff]   ;;  %v2144_v22 = vld [vmem:[#allocation6] sm:$0xff]  }
  0xd1   : > { %s548_s12 = scalar_lea.vmem %s2974_s1, %s1833_s28  ;;  %1895 = vmatpush3.bf16.msra.mxu0 %v563_v6  ;;  %1901 = vmatpush3.bf16.msra.mxu1 %v564_v9  ;;  %v2145_v23 = vld [vmem:[#allocation6 + $0x8] sm:$0xff]   ;;  %v2146_v24 = vld [vmem:[#allocation6 + $0x10] sm:$0xff]   ;;  %v2147_v25 = vld [vmem:[#allocation6 + $0x18] sm:$0xff]   ;;  %v2829_v39 = vshrl.u32 %v569_v11, 7  ;;  %vm1007_vm7 = vcmask 1043456   ;;  %s1767_s2 = sshll.u32 %s3022_s27, 1 }
  0xd2   : > { %v565_v2 = vld [vmem:[%s548_s12] sm:$0xff]  ;;  %v566_v3 = vld [vmem:[%s548_s12 + $0x8] sm:$0xff]  ;;  %1906 = vmatprep.subr.bf16.mxu1 %v2458_v1  ;;  %713 = vmatprep.subr.bf16.mxu0 %v2140_v10  ;;  %v2150_v37 = vld [vmem:[#allocation6 + $0x30] sm:$0xff]   ;;  %s3013_s17 = sld [smem:[#allocation17_spill]]  ;;  %vm979_vm8 = vcmask 64512   ;;  %s3014_s20 = sld [smem:[#allocation18_spill]] }
  0xd3   : > { %572 = vperm.xlu0 %2137, %v565_v2   ;;  %v2148_v26 = vld [vmem:[#allocation6 + $0x20] sm:$0xff]   ;;  %v2149_v36 = vld [vmem:[#allocation6 + $0x28] sm:$0xff]   ;;  %v2151_v38 = vld [vmem:[#allocation6 + $0x38] sm:$0xff]   ;;  %v685_v40 = vsub.s32 1, %v2829_v39  ;;  %s3015_s25 = sld [smem:[#allocation19_spill]]  ;;  %s3016_s13 = sld [smem:[#allocation20_spill]] }
  0xd4   : > { %v2835_v41 = vld [vmem:[%s2977_s4] sm:$0x3]  ;;  %vm1593_vm15 = vcmask 7168  }
  0xd5   : > { %v686_v42 = vrot.slane %v2835_v41, %v685_v40 }
  0xd7   : > { %575 = vperm.xlu0 %2137, %v566_v3  }
  0xd8   : > { %s552_s9 = scalar_lea.vmem %s3013_s17, %s1767_s2 }
  0xd9   : > { %v1790_v9 = vld [vmem:[%s552_s9 + $0x1] ss:$0 sm:$0xff]  ;;  %s557_s12 = scalar_lea.vmem %s3016_s13, %s1833_s28 }
 0x152   : > { %v573_v13 = vpop.permute.xlu0 %572 }
 0x153   : > { %vm577_vm1 = vcmp.eq.s32.totalorder %v573_v13, %v2810_v12 }
 0x154   : > { %v1770_v14 = vsel %vm577_vm1, 1.0, %v2458_v1 }
 0x155   : > { %v583_v16 = vpack.c.bf16 %v1770_v14, %v1770_v14 }
 0x156   : > { %v576_v17 = vpop.permute.xlu0 %575 }
 0x157   : > { %vm578_vm3 = vcmp.eq.s32.totalorder %v576_v17, %v2810_v12  ;;  %1897 = vmatmul.mubr.msk.bf16.vlgmr.msra.gmra.mrb[0].mxu0 %vm585_vm2, %v583_v16 }
 0x158   : > { %v1771_v18 = vsel %vm578_vm3, 1.0, %v2458_v1  ;;  %714 = vmatpush1.bf16.msra.mxu0 %v2138_v15  ;;  %745 = vmatprep.mubr.bf16.mxu0 %v2457_v0  ;;  %v1789_v0 = vld [vmem:[%s552_s9] ss:$0 sm:$0xff] }
 0x159   : > { %v584_v19 = vpack.c.bf16 %v1771_v18, %v1771_v18  ;;  %715 = vmatprep.subr.bf16.mxu0 %v2143_v20 }
 0x15b   : > { %1903 = vmatmul.mubr.msk.bf16.vlgmr.msra.gmra.mrb[0].mxu1 %vm585_vm2, %v584_v19 }
 0x15c   : > { %1922 = vmatprep.mubr.msk.bf16.mxu1 %vm2459_vm0, %v2458_v1  ;;  %716 = vmatpush1.bf16.msra.mxu0 %v2141_v21 }
 0x15d   : > { %1926 = vmatprep.subr.bf16.mxu0 %v2458_v1  ;;  %1907 = vmatpush3.bf16.msra.mxu1 %v2144_v22 }
 0x15e   : > { %1908 = vmatprep.subr.bf16.mxu1 %v2458_v1 }
 0x161   : > { %1909 = vmatpush3.bf16.msra.mxu1 %v2145_v23 }
 0x162   : > { %1910 = vmatprep.subr.bf16.mxu1 %v2458_v1 }
 0x165   : > { %1911 = vmatpush3.bf16.msra.mxu1 %v2146_v24 }
 0x166   : > { %1912 = vmatprep.subr.bf16.mxu1 %v2458_v1 }
 0x169   : > { %1913 = vmatpush3.bf16.msra.mxu1 %v2147_v25 }
 0x16a   : > { %1914 = vmatprep.subr.bf16.mxu1 %v2458_v1 }
 0x16d   : > { %1915 = vmatpush3.bf16.msra.mxu1 %v2148_v26 }
 0x16e   : > { %1916 = vmatprep.subr.bf16.mxu1 %v2458_v1 }
 0x171   : > { %1917 = vmatpush3.bf16.msra.mxu1 %v2149_v36 }
 0x172   : > { %1918 = vmatprep.subr.bf16.mxu1 %v2458_v1 }
 0x175   : > { %1919 = vmatpush3.bf16.msra.mxu1 %v2150_v37 }
 0x176   : > { %1920 = vmatprep.subr.bf16.mxu1 %v2458_v1 }
 0x179   : > { %1921 = vmatpush3.bf16.msra.mxu1 %v2151_v38 }
 0x17a   : > { %1950 = vmatprep.subr.bf16.mxu1 %v2458_v1 }
 0x22a   : > { %v623_v27 = vpop.f32.mrb[0].mxu0 }
 0x22b   : > { %v1898_v28 = vpop.f32.mrb[1].mxu0 }
 0x22c   : > { %v626_v29 = vpop.f32.mrb[2].mxu0  ;;  %v2161_v28 = vld [vmem:[#allocation9 + $0x8] sm:$0xff]  }
 0x22d   : > { %v1899_v30 = vpop.f32.mrb[3].mxu0  ;;  %v2162_v29 = vld [vmem:[#allocation9 + $0x10] sm:$0xff]  }
 0x22e   : > { %v666_v31 = vpop.f32.mrb[0].mxu1  ;;  %v2163_v30 = vld [vmem:[#allocation9 + $0x18] sm:$0xff]  }
 0x22f   : > { %v672_v32 = vpack.c.bf16 %v666_v31, %v623_v27  ;;  %v1904_v33 = vpop.f32.mrb[1].mxu1  ;;  %v2160_v27 = vld [vmem:[#allocation9] sm:$0xff]  }
 0x230   : > { %v669_v34 = vpop.f32.mrb[2].mxu1  ;;  %v2164_v31 = vld [vmem:[#allocation9 + $0x20] sm:$0xff]  }
 0x231   : > { %v1905_v35 = vpop.f32.mrb[3].mxu1  ;;  %1778 = vmatmul.mubr.msk.bf16.vlgmr.msra.gmra.mrb[4].mxu0 %vm709_vm4, %v672_v32 }
 0x232   : > { %1928 = vmatprep.mubr.msk.bf16.mxu0 %vm2459_vm0, %v2458_v1 }
 0x304   : > { %v2838_v43 = vpop.f32.mrb[4].mxu0 }
 0x305   : > { %v749_v44 = vpop.f32.mrb[5].mxu0 }
 0x306   : > { %v750_v45 = vadd.f32 %v749_v44, %v686_v42  ;;  %v2840_v46 = vpop.f32.mrb[6].mxu0 }
 0x307   : > { %v753_v47 = vpop.f32.mrb[7].mxu0 }
 0x308   : > { %vm757_vm5 = vcmp.ge.f32.partialorder %v750_v45, 0.0  ;;  %v761_v48 = vmul.f32 0.1, %v750_v45  ;;  %v754_v49 = vadd.f32 %v753_v47, %v686_v42  ;;  %v2152_v42 = vld [vmem:[#allocation7] sm:$0xff]   ;;  %v2154_v47 = vld [vmem:[#allocation7 + $0x10] sm:$0xff]  }
 0x30a   : > { %v765_v50 = vsel %vm757_vm5, %v750_v45, %v761_v48  ;;  %vm759_vm6 = vcmp.ge.f32.partialorder %v754_v49, 0.0  ;;  %v763_v51 = vmul.f32 0.1, %v754_v49  ;;  %v2153_v45 = vld [vmem:[#allocation7 + $0x8] sm:$0xff]   ;;  %v2155_v48 = vld [vmem:[#allocation7 + $0x18] sm:$0xff]  }
 0x30b   : > { %v1835_v52 = vpack.c.bf16 %v765_v50, %v765_v50 }
 0x30c   : > { %v767_v53 = vsel %vm759_vm6, %v754_v49, %v763_v51  ;;  %v681_v49 = vsub.s32 0, %v2829_v39 }
 0x30d   : > { %v768_v54 = vpack.c.bf16 %v767_v53, %v765_v50  ;;  %1927 = vmatpush3.bf16.xpose.msra.mxu0 %v1835_v52  ;;  %v2845_v58 = vpack.c.bf16 %v767_v53, %v767_v53  ;;  %v1009_v62 = vsel %vm1007_vm7, %v1835_v52, 0  ;;  %v2156_v50 = vld [vmem:[#allocation7 + $0x20] sm:$0xff]   ;;  %v2157_v52 = vld [vmem:[#allocation7 + $0x28] sm:$0xff]  }
 0x30e   : > { %1932 = vmatprep.subr.bf16.mxu0 %v2458_v1  ;;  %v682_v51 = vrot.slane %v2835_v41, %v681_v49 }
 0x30f   : > { %1923 = vmatmul.mubr.bf16.vlgmr.msra.gmra.mrb[4].mxu1 %v768_v54  ;;  %v1055_v37 = vsel %vm1007_vm7, %v2845_v58, 0 }
 0x310   : > { %1966 = vmatprep.mubr.msk.bf16.mxu1 %vm2459_vm0, %v2458_v1  ;;  %1951 = vmatpush3.bf16.msra.mxu1 %v2160_v27  ;;  %v752_v53 = vadd.f32 %v2840_v46, %v682_v51  ;;  %v748_v54 = vadd.f32 %v2838_v43, %v682_v51  ;;  %v2165_v46 = vld [vmem:[#allocation9 + $0x28] sm:$0xff]   ;;  %v2183_v27 = vld [vmem:[#allocation12 + $0x38] sm:$0xff]  }
 0x311   : > { %1952 = vmatprep.subr.bf16.mxu1 %v2458_v1 }
 0x312   : > { %vm758_vm9 = vcmp.ge.f32.partialorder %v752_v53, 0.0  ;;  %v760_v39 = vmul.f32 0.1, %v748_v54  ;;  %vm756_vm10 = vcmp.ge.f32.partialorder %v748_v54, 0.0 }
 0x314   : > { %1953 = vmatpush3.bf16.msra.mxu1 %v2161_v28 }
 0x315   : > { %1954 = vmatprep.subr.bf16.mxu1 %v2458_v1 }
 0x318   : > { %1955 = vmatpush3.bf16.msra.mxu1 %v2162_v29  ;;  %v1809_v29 = vld [vmem:[#allocation10] ss:$0 sm:$0xff] }
 0x319   : > { %1956 = vmatprep.subr.bf16.mxu1 %v2458_v1 }
 0x31c   : > { %1957 = vmatpush3.bf16.msra.mxu1 %v2163_v30 }
 0x31d   : > { %1958 = vmatprep.subr.bf16.mxu1 %v2458_v1 }
 0x320   : > { %1959 = vmatpush3.bf16.msra.mxu1 %v2164_v31 }
 0x321   : > { %1960 = vmatprep.subr.bf16.mxu1 %v2458_v1 }
 0x324   : > { %1961 = vmatpush3.bf16.msra.mxu1 %v2165_v46  ;;  %v1828_v46 = vld [vmem:[%s3015_s25] ss:$0 sm:$0xff] }
 0x325   : > { %1962 = vmatprep.subr.bf16.mxu1 %v2458_v1 }
 0x3e2   : > { %v867_v55 = vpop.f32.mrb[4].mxu1 }
 0x3e3   : > { %v874_v56 = vpack.c.bf16 %v867_v55, %v867_v55  ;;  %v1924_v57 = vpop.f32.mrb[5].mxu1  ;;  %v2158_v55 = vld [vmem:[#allocation7 + $0x30] sm:$0xff]  }
 0x3e4   : > { %v870_v59 = vpop.f32.mrb[6].mxu1  ;;  %v2159_v57 = vld [vmem:[#allocation7 + $0x38] sm:$0xff]  }
 0x3e5   : > { %v1925_v60 = vpop.f32.mrb[7].mxu1  ;;  %1929 = vmatmul.mubr.bf16.vlgmr.msra.gmra.mrb[8].mxu0 %v874_v56  ;;  %v875_v61 = vpack.c.bf16 %v870_v59, %v870_v59  ;;  %v762_v56 = vmul.f32 0.1, %v752_v53  ;;  %v2166_v59 = vld [vmem:[#allocation9 + $0x30] sm:$0xff]  }
 0x3e6   : > { %1933 = vmatpush3.bf16.xpose.msra.mxu0 %v2845_v58  ;;  %1934 = vmatprep.mubr.msk.bf16.mxu0 %vm2459_vm0, %v2458_v1  ;;  %v2890_v58 = vsel %vm756_vm10, %v748_v54, %v760_v39  ;;  %v2167_v60 = vld [vmem:[#allocation9 + $0x38] sm:$0xff]  }
 0x3e7   : > { %1938 = vmatprep.subr.bf16.mxu0 %v2458_v1  ;;  %v2888_v41 = vsel %vm758_vm9, %v752_v53, %v762_v56  ;;  %1963 = vmatpush3.bf16.msra.mxu1 %v2166_v59 }
 0x3e8   : > { %v1097_v43 = vpack.c.bf16 %v2888_v41, %v2890_v58  ;;  %1964 = vmatprep.subr.bf16.mxu1 %v2458_v1 }
 0x3eb   : > { %1965 = vmatpush3.bf16.msra.mxu1 %v2167_v60 }
 0x3ec   : > { %1990 = vmatprep.subr.bf16.mxu1 %v2458_v1 }
 0x3ed   : > { %1935 = vmatmul.mubr.bf16.vlgmr.msra.gmra.mrb[12].mxu0 %v875_v61 }
 0x3ee   : > { %1939 = vmatpush3.bf16.msra.mxu0 %v1009_v62  ;;  %1940 = vmatprep.mubr.msk.bf16.mxu0 %vm2459_vm0, %v2458_v1 }
 0x3ef   : > { %1944 = vmatprep.subr.bf16.mxu0 %v2458_v1 }
 0x4b8   : > { %v917_v63 = vpop.f32.mrb[8].mxu0 }
 0x4b9   : > { %v963_v2 = vmul.f32 0.17677669, %v917_v63  ;;  %v1930_v3 = vpop.f32.mrb[9].mxu0 }
 0x4ba   : > { %v920_v4 = vpop.f32.mrb[10].mxu0 }
 0x4bb   : > { %v1931_v5 = vpop.f32.mrb[11].mxu0  ;;  %v977_v6 = vadd.f32 %v1789_v0, %v963_v2 }
 0x4bd   : > { %v980_v7 = vsel %vm979_vm8, %v977_v6, -inf }
 0x4be   : > { %981 = vmax.xlane.f32.xlu1 %v980_v7 }
 0x4c0   : > { %v957_v8 = vpop.f32.mrb[12].mxu0 }
 0x4c1   : > { %v964_v10 = vmul.f32 0.17677669, %v957_v8  ;;  %v1936_v11 = vpop.f32.mrb[13].mxu0 }
 0x4c2   : > { %v960_v13 = vpop.f32.mrb[14].mxu0  ;;  %v2168_v11 = vld [vmem:[%s3014_s20] sm:$0xff]  }
 0x4c3   : > { %v1937_v14 = vpop.f32.mrb[15].mxu0  ;;  %v978_v15 = vadd.f32 %v1790_v9, %v964_v10  ;;  %v2169_v13 = vld [vmem:[#allocation12] sm:$0xff]  }
 0x4c4   : > { %v2170_v14 = vld [vmem:[%s3014_s20 + $0x8] sm:$0xff]  }
 0x4c5   : > { %v983_v16 = vsel %vm979_vm8, %v978_v15, -inf }
 0x4c6   : > { %984 = vmax.xlane.f32.xlu1 %v983_v16  ;;  %v2172_v16 = vld [vmem:[%s3014_s20 + $0x10] sm:$0xff]  }
 0x54b   : > { %v982_v17 = vpop.xlane.xlu1 %981 }
 0x54c   : > { %v986_v18 = vsub.f32 %v977_v6, %v982_v17  ;;  %v2173_v17 = vld [vmem:[#allocation12 + $0x10] sm:$0xff]  }
 0x54e   : > { %v988_v19 = vmul.f32 1.442695, %v986_v18  ;;  %v2174_v18 = vld [vmem:[%s3014_s20 + $0x18] sm:$0xff]  }
 0x550   : > { %2184 = vpow2.f32 %v988_v19  ;;  %v2175_v19 = vld [vmem:[#allocation12 + $0x18] sm:$0xff]  }
 0x553   : > { %v985_v20 = vpop.xlane.xlu1 %984 }
 0x554   : > { %v987_v21 = vsub.f32 %v978_v15, %v985_v20  ;;  %v2171_v15 = vld [vmem:[#allocation12 + $0x8] sm:$0xff]   ;;  %v2176_v20 = vld [vmem:[%s3014_s20 + $0x20] sm:$0xff]  }
 0x556   : > { %v990_v22 = vmul.f32 1.442695, %v987_v21  ;;  %v2177_v21 = vld [vmem:[#allocation12 + $0x20] sm:$0xff]  }
 0x558   : > { %2186 = vpow2.f32 %v990_v22  ;;  %v2178_v22 = vld [vmem:[%s3014_s20 + $0x28] sm:$0xff]  }
 0x55a   : > { %v2185_v23 = vpop.eup %2184 }
 0x55b   : > { %v992_v24 = vsel %vm979_vm8, %v2185_v23, 0.0 }
 0x55c   : > { %993 = vadd.xlane.f32.xlu0 %v992_v24  ;;  %v2180_v24 = vld [vmem:[%s3014_s20 + $0x30] sm:$0xff]  }
 0x562   : > { %v2187_v25 = vpop.eup %2186 }
 0x563   : > { %v995_v26 = vsel %vm979_vm8, %v2187_v25, 0.0 }
 0x564   : > { %996 = vadd.xlane.f32.xlu1 %v995_v26  ;;  %v2182_v26 = vld [vmem:[%s3014_s20 + $0x38] sm:$0xff]  }
 0x5e9   : > { %v994_v32 = vpop.xlane.xlu0 %993 }
 0x5ea   : > { %2188 = vrcp.f32 %v994_v32 }
 0x5f1   : > { %v997_v33 = vpop.xlane.xlu1 %996 }
 0x5f2   : > { %2190 = vrcp.f32 %v997_v33 }
 0x5f4   : > { %v2189_v34 = vpop.eup %2188 }
 0x5f5   : > { %v1000_v35 = vmul.f32 %v2189_v34, %v2185_v23  ;;  %v2179_v23 = vld [vmem:[#allocation12 + $0x28] sm:$0xff]  }
 0x5f7   : > { %v1002_v36 = vpack.c.bf16 %v1000_v35, %v1000_v35 }
 0x5f9   : > { %1941 = vmatmul.mubr.msk.bf16.vlgmr.msra.gmra.mrb[16].mxu0 %vm979_vm8, %v1002_v36 }
 0x5fa   : > { %1945 = vmatpush3.bf16.msra.mxu0 %v1055_v37  ;;  %1946 = vmatprep.mubr.msk.bf16.mxu0 %vm2459_vm0, %v2458_v1 }
 0x5fb   : > { %1970 = vmatprep.subr.bf16.mxu0 %v2458_v1 }
 0x5fc   : > { %v2191_v38 = vpop.eup %2190 }
 0x5fd   : > { %v1001_v40 = vmul.f32 %v2191_v38, %v2187_v25  ;;  %v2181_v25 = vld [vmem:[#allocation12 + $0x30] sm:$0xff]  }
 0x5ff   : > { %v1003_v44 = vpack.c.bf16 %v1001_v40, %v1001_v40 }
 0x601   : > { %1947 = vmatmul.mubr.msk.bf16.vlgmr.msra.gmra.mrb[20].mxu0 %vm979_vm8, %v1003_v44 }
 0x602   : > { %1971 = vmatpush3.bf16.msra.mxu0 %v2152_v42  ;;  %1986 = vmatprep.mubr.msk.bf16.mxu0 %vm2459_vm0, %v2458_v1 }
 0x603   : > { %1972 = vmatprep.subr.bf16.mxu0 %v2458_v1 }
 0x606   : > { %1973 = vmatpush3.bf16.msra.mxu0 %v2153_v45 }
 0x607   : > { %1974 = vmatprep.subr.bf16.mxu0 %v2458_v1 }
 0x60a   : > { %1975 = vmatpush3.bf16.msra.mxu0 %v2154_v47 }
 0x60b   : > { %1976 = vmatprep.subr.bf16.mxu0 %v2458_v1 }
 0x60e   : > { %1977 = vmatpush3.bf16.msra.mxu0 %v2155_v48 }
 0x60f   : > { %1978 = vmatprep.subr.bf16.mxu0 %v2458_v1 }
 0x612   : > { %1979 = vmatpush3.bf16.msra.mxu0 %v2156_v50 }
 0x613   : > { %1980 = vmatprep.subr.bf16.mxu0 %v2458_v1 }
 0x616   : > { %1981 = vmatpush3.bf16.msra.mxu0 %v2157_v52 }
 0x617   : > { %1982 = vmatprep.subr.bf16.mxu0 %v2458_v1 }
 0x61a   : > { %1983 = vmatpush3.bf16.msra.mxu0 %v2158_v55 }
 0x61b   : > { %1984 = vmatprep.subr.bf16.mxu0 %v2458_v1 }
 0x61e   : > { %1985 = vmatpush3.bf16.msra.mxu0 %v2159_v57 }
 0x61f   : > { %2010 = vmatprep.subr.bf16.mxu0 %v2458_v1 }
 0x621   : > { %1987 = vmatmul.mubr.bf16.vlgmr.msra.gmra.mrb[24].mxu0 %v1097_v43 }
 0x622   : > { %2026 = vmatprep.mubr.msk.bf16.mxu0 %vm2459_vm0, %v2458_v1  ;;  %2011 = vmatpush3.bf16.msra.mxu0 %v2168_v11 }
 0x623   : > { %2012 = vmatprep.subr.bf16.mxu0 %v2458_v1 }
 0x626   : > { %2013 = vmatpush3.bf16.msra.mxu0 %v2170_v14 }
 0x627   : > { %2014 = vmatprep.subr.bf16.mxu0 %v2458_v1 }
 0x62a   : > { %2015 = vmatpush3.bf16.msra.mxu0 %v2172_v16 }
 0x62b   : > { %2016 = vmatprep.subr.bf16.mxu0 %v2458_v1 }
 0x62e   : > { %2017 = vmatpush3.bf16.msra.mxu0 %v2174_v18 }
 0x62f   : > { %2018 = vmatprep.subr.bf16.mxu0 %v2458_v1 }
 0x632   : > { %2019 = vmatpush3.bf16.msra.mxu0 %v2176_v20 }
 0x633   : > { %2020 = vmatprep.subr.bf16.mxu0 %v2458_v1 }
 0x636   : > { %2021 = vmatpush3.bf16.msra.mxu0 %v2178_v22 }
 0x637   : > { %2022 = vmatprep.subr.bf16.mxu0 %v2458_v1 }
 0x63a   : > { %2023 = vmatpush3.bf16.msra.mxu0 %v2180_v24 }
 0x63b   : > { %2024 = vmatprep.subr.bf16.mxu0 %v2458_v1 }
 0x63e   : > { %2025 = vmatpush3.bf16.msra.mxu0 %v2182_v26 }
 0x6cc   : > { %v2900_v61 = vpop.f32.mrb[16].mxu0 }
 0x6cd   : > { %v1942_v62 = vpop.f32.mrb[17].mxu0 }
 0x6ce   : > { %v1048_v63 = vpop.f32.mrb[18].mxu0 }
 0x6cf   : > { %v1943_v0 = vpop.f32.mrb[19].mxu0 }
 0x6d4   : > { %v2902_v2 = vpop.f32.mrb[20].mxu0 }
 0x6d5   : > { %v1098_v3 = vpack.c.bf16 %v2902_v2, %v2900_v61  ;;  %v1948_v4 = vpop.f32.mrb[21].mxu0 }
 0x6d6   : > { %v1094_v5 = vpop.f32.mrb[22].mxu0 }
 0x6d7   : > { %v1949_v6 = vpop.f32.mrb[23].mxu0  ;;  %1967 = vmatmul.mubr.bf16.vlgmr.msra.gmra.mrb[8].mxu1 %v1098_v3 }
 0x6d8   : > { %2006 = vmatprep.mubr.msk.bf16.mxu1 %vm2459_vm0, %v2458_v1  ;;  %1991 = vmatpush3.bf16.msra.mxu1 %v2169_v13 }
 0x6d9   : > { %1992 = vmatprep.subr.bf16.mxu1 %v2458_v1 }
 0x6dc   : > { %1993 = vmatpush3.bf16.msra.mxu1 %v2171_v15 }
 0x6dd   : > { %1994 = vmatprep.subr.bf16.mxu1 %v2458_v1 }
 0x6e0   : > { %1995 = vmatpush3.bf16.msra.mxu1 %v2173_v17 }
 0x6e1   : > { %1996 = vmatprep.subr.bf16.mxu1 %v2458_v1 }
 0x6e4   : > { %1997 = vmatpush3.bf16.msra.mxu1 %v2175_v19 }
 0x6e5   : > { %1998 = vmatprep.subr.bf16.mxu1 %v2458_v1 }
 0x6e8   : > { %1999 = vmatpush3.bf16.msra.mxu1 %v2177_v21 }
 0x6e9   : > { %2000 = vmatprep.subr.bf16.mxu1 %v2458_v1 }
 0x6ec   : > { %2001 = vmatpush3.bf16.msra.mxu1 %v2179_v23 }
 0x6ed   : > { %2002 = vmatprep.subr.bf16.mxu1 %v2458_v1 }
 0x6f0   : > { %2003 = vmatpush3.bf16.msra.mxu1 %v2181_v25 }
 0x6f1   : > { %2004 = vmatprep.subr.bf16.mxu1 %v2458_v1 }
 0x6f4   : > { %v1302_v7 = vpop.f32.mrb[24].mxu0  ;;  %2005 = vmatpush3.bf16.msra.mxu1 %v2183_v27 }
 0x6f5   : > { %v1988_v8 = vpop.f32.mrb[25].mxu0 }
 0x6f6   : > { %v1305_v9 = vpop.f32.mrb[26].mxu0 }
 0x6f7   : > { %v1989_v10 = vpop.f32.mrb[27].mxu0 }
 0x7aa   : > { %v1213_v28 = vpop.f32.mrb[8].mxu1 }
 0x7ab   : > { %v1303_v30 = vadd.f32 %v1302_v7, %v1213_v28  ;;  %v1968_v31 = vpop.f32.mrb[9].mxu1 }
 0x7ac   : > { %v1216_v32 = vpop.f32.mrb[10].mxu1 }
 0x7ad   : > { %v1316_v33 = vadd.f32 %v1809_v29, %v1303_v30  ;;  %v1306_v34 = vadd.f32 %v1305_v9, %v1216_v32  ;;  %v1969_v35 = vpop.f32.mrb[11].mxu1 }
 0x7af   : > { %v1810_v36 = vmul.f32 -1.442695, %v1316_v33  ;;  %v1317_v37 = vadd.f32 %v1809_v29, %v1306_v34 }
 0x7b1   : > { %2192 = vpow2.f32 %v1810_v36  ;;  %v1811_v38 = vmul.f32 -1.442695, %v1317_v37 }
 0x7b3   : > { %2194 = vpow2.f32 %v1811_v38 }
 0x7bb   : > { %v2193_v40 = vpop.eup %2192 }
 0x7bc   : > { %v1324_v42 = vadd.f32 1.0, %v2193_v40 }
 0x7bd   : > { %v2195_v44 = vpop.eup %2194 }
 0x7be   : > { %2196 = vrcp.f32 %v1324_v42  ;;  %v1325_v1 = vadd.f32 1.0, %v2195_v44 }
 0x7c0   : > { %2198 = vrcp.f32 %v1325_v1 }
 0x7c8   : > { %v2197_v45 = vpop.eup %2196 }
 0x7c9   : > { %v1333_v47 = vsub.f32 1.0, %v2197_v45  ;;  %v1330_v49 = vmul.f32 %v2197_v45, %v2890_v58 }
 0x7ca   : > { %v2199_v48 = vpop.eup %2198 }
 0x7cb   : > { %v1331_v50 = vmul.f32 %v2199_v48, %v2888_v41  ;;  %v1334_v51 = vsub.f32 1.0, %v2199_v48  ;;  %v1335_v52 = vmul.f32 %v1333_v47, %v2900_v61 }
 0x7cd   : > { %v1332_v53 = vpack.c.bf16 %v1331_v50, %v1330_v49  ;;  %v1336_v54 = vmul.f32 %v1334_v51, %v2902_v2 }
 0x7cf   : > { %2027 = vmatmul.mubr.bf16.vlgmr.msra.gmra.mrb[28].mxu0 %v1332_v53  ;;  %v1337_v55 = vpack.c.bf16 %v1336_v54, %v1335_v52 }
 0x7d1   : > { %2007 = vmatmul.mubr.bf16.vlgmr.msra.gmra.mrb[12].mxu1 %v1337_v55 }
 0x8a2   : > { %v1541_v56 = vpop.f32.mrb[28].mxu0 }
 0x8a3   : > { %v2028_v39 = vpop.f32.mrb[29].mxu0 }
 0x8a4   : > { %v1452_v57 = vpop.f32.mrb[12].mxu1  ;;  %v1544_v43 = vpop.f32.mrb[30].mxu0 }
 0x8a5   : > { %v1542_v58 = vadd.f32 %v1541_v56, %v1452_v57  ;;  %v2008_v59 = vpop.f32.mrb[13].mxu1  ;;  %v2029_v41 = vpop.f32.mrb[31].mxu0 }
 0x8a6   : > { %v1455_v60 = vpop.f32.mrb[14].mxu1 }
 0x8a7   : > { %v1545_v62 = vadd.f32 %v1544_v43, %v1455_v60  ;;  %v2009_v61 = vpop.f32.mrb[15].mxu1  ;;  %v1555_v63 = vadd.f32 %v1828_v46, %v1542_v58 }
 0x8a9   : > { %1557 = vmax.xlane.f32.xlu1 %v1555_v63  ;;  %v1556_v0 = vadd.f32 %v1828_v46, %v1545_v62 }
 0x8ad   : > { %1559 = vmax.xlane.f32.xlu1 %v1556_v0 }
 0x936   : > { %v1558_v2 = vpop.xlane.xlu1 %1557 }
 0x937   : > { %vm1561_vm11 = vcmp.eq.f32.partialorder %v1555_v63, %v1558_v2 }
 0x938   : > { %v1563_v3 = vsel %vm1561_vm11, %v2810_v12, 128 }
 0x939   : > { %v1566_v4 = vshra.s32 %v1563_v3, 16  ;;  %v1565_v10 = vand.u32 65535, %v1563_v3 }
 0x93a   : > { %v1560_v5 = vpop.xlane.xlu1 %1559 }
 0x93b   : > { %vm1562_vm12 = vcmp.eq.f32.partialorder %v1556_v0, %v1560_v5  ;;  %v1568_v6 = vcvt.s32.f32 %v1566_v4  ;;  %v1567_v14 = vcvt.s32.f32 %v1565_v10 }
 0x93c   : > { %v1564_v7 = vsel %vm1562_vm12, %v2810_v12, 128 }
 0x93d   : > { %1569 = vmin.xlane.f32.xlu1 %v1568_v6  ;;  %v1580_v8 = vshra.s32 %v1564_v7, 16  ;;  %v1579_v11 = vand.u32 65535, %v1564_v7 }
 0x93f   : > { %v1582_v9 = vcvt.s32.f32 %v1580_v8  ;;  %v1581_v17 = vcvt.s32.f32 %v1579_v11 }
 0x941   : > { %1583 = vmin.xlane.f32.xlu1 %v1582_v9 }
 0x9ca   : > { %v1570_v13 = vpop.xlane.xlu1 %1569 }
 0x9cb   : > { %vm1571_vm13 = vcmp.eq.f32.partialorder %v1568_v6, %v1570_v13  ;;  %v1576_v19 = vcvt.f32.s32 %v1570_v13 }
 0x9cc   : > { %v1572_v15 = vsel %vm1571_vm13, %v1567_v14, inf }
 0x9cd   : > { %1573 = vmin.xlane.f32.xlu1 %v1572_v15  ;;  %v1577_v12 = vshll.u32 %v1576_v19, 16 }
 0x9ce   : > { %v1584_v16 = vpop.xlane.xlu1 %1583 }
 0x9cf   : > { %vm1585_vm14 = vcmp.eq.f32.partialorder %v1582_v9, %v1584_v16  ;;  %v1590_v21 = vcvt.f32.s32 %v1584_v16 }
 0x9d0   : > { %v1586_v18 = vsel %vm1585_vm14, %v1581_v17, inf }
 0x9d1   : > { %1587 = vmin.xlane.f32.xlu1 %v1586_v18  ;;  %v1591_v25 = vshll.u32 %v1590_v21, 16 }
 0xa5a   : > { %v1574_v20 = vpop.xlane.xlu1 %1573 }
 0xa5b   : > { %v1575_v22 = vcvt.f32.s32 %v1574_v20 }
 0xa5d   : > { %v1578_v23 = vadd.s32 %v1577_v12, %v1575_v22 }
 0xa5e   : > { %v1588_v24 = vpop.xlane.xlu1 %1587 }
 0xa5f   : > { %1594 = vst.msk [vmem:[%s557_s12] sm:$0xff] %vm1593_vm15, %v1578_v23  ;;  %v1589_v26 = vcvt.f32.s32 %v1588_v24 }
 0xa61   : > { %v1592_v27 = vadd.s32 %v1591_v25, %v1589_v26 }
 0xa63   : > { %1595 = vst.msk [vmem:[%s557_s12 + $0x8] sm:$0xff] %vm1593_vm15, %v1592_v27 }
 0xa64 PF: > { %p25_p0 = scmp.ge.s32.totalorder %s2710_s29, 4   ;;  %s3017_s21 = smov %s2436_s22 }
 0xa65   : > { %s3018_s22 = smov %s2440_s23  ;;  %s3019_s23 = smov %s2722_s30 }
 0xa66   : > { %s3020_s24 = smov %s2710_s29  ;;  %27 = sbr.rel (!%p25_p0) target bundleno = 11 (0xb), region = 138 }
 0xa6d   :  { %1617 = vsyncpa [#allocation3], 1 }
 0xa6e   :  { %1619 = vsyncpa [#allocation3 + $0x1], 1 }
 0xa6f   :  { %1620 = vsyncpa [#allocation5], 1 }
 0xa70   :  { %1621 = vsyncpa [#allocation8], 1 }
 0xa71   :  { %1622 = vsyncpa [#allocation11], 1 }

</bundles_post_ra>
